<compile_context>
chip_gen: v7x
topology: tpu7x:2x2x1
jax: 0.10.0
libtpu: 0.0.40
codegen_flags: <defaults>
</compile_context>

<pallas_src>
import re

import jax
import jax.numpy as jnp
import numpy as np
from jax.experimental import pallas as pl
from jax.experimental.pallas import tpu as pltpu


def _round_up(x, m):
    return ((x + m - 1) // m) * m


def _tpu_generation():
    """Best-effort TPU generation (5, 6, 7, ...); defaults to 6."""
    try:
        kind = jax.devices()[0].device_kind.lower()
        m = re.search(r"v(\d+)", kind)
        if m:
            return int(m.group(1))
    except Exception:
        pass
    return 6


# ----------------------------- Pallas kernel ----------------------------------

def _conv_stats_kernel(p_ref, w_ref, y_ref, sum_ref, sq_ref, acc_ref):
    """One (group, Co-tile, M-tile) output block, contracted over Kd chunks.

    p_ref   : (M_TILE, KD_TILE)   bf16 im2col patch chunk (k-th contraction tile)
    w_ref   : (Kd_p, CO_TILE)     bf16 weight, VMEM-resident across m & k
    y_ref   : (M_TILE, CO_TILE)   bf16 conv output tile
    sum_ref : (1, CO_TILE)        fp32 per-tile channel sum
    sq_ref  : (1, CO_TILE)        fp32 per-tile channel sum of squares
    acc_ref : (M_TILE, CO_TILE)   fp32 MXU accumulator (scratch)
    """
    k = pl.program_id(3)
    kd_tile = p_ref.shape[1]

    @pl.when(k == 0)
    def _():
        acc_ref[...] = jnp.zeros_like(acc_ref)

    # Weight stays resident; slice out the k-th contraction chunk in VMEM.
    w_blk = w_ref[pl.ds(pl.multiple_of(k * kd_tile, kd_tile), kd_tile), :]
    acc_ref[...] += jnp.dot(p_ref[...], w_blk,
                            preferred_element_type=jnp.float32)

    @pl.when(k == pl.num_programs(3) - 1)
    def _():
        acc = acc_ref[...]                                   # fp32
        y_ref[...] = acc.astype(y_ref.dtype)                 # bf16 writeback
        # Padded M rows are exactly zero -> contribute nothing to either sum.
        sum_ref[...] = jnp.sum(acc, axis=0, keepdims=True)
        sq_ref[...] = jnp.sum(acc * acc, axis=0, keepdims=True)


# ------------------------------ JAX wrapper ------------------------------------

def conv_bn_act(x_nchw, weight, gamma, beta, *, kernel_size, stride,
                groups=1, use_act=True, eps=1e-5):
    """Forward pass of ConvBNAct. x_nchw: (N, Cin, H, W) fp32, returns NCHW fp32."""
    N, Cin, H, W = x_nchw.shape
    Cout = weight.shape[0]
    K = kernel_size
    pad = (K - 1) // 2
    assert Cin % groups == 0 and Cout % groups == 0
    Cin_g = Cin // groups
    Cout_g = Cout // groups
    Kd_g = Cin_g * K * K

    Hout = (H + 2 * pad - K) // stride + 1
    Wout = (W + 2 * pad - K) // stride + 1
    M = N * Hout * Wout

    gen = _tpu_generation()

    # ---- im2col directly in (groups, M, Kd_g) layout, bf16 from the start so
    #      every XLA copy of the K^2-inflated tensor is half width; the group
    #      split happens on the small pre-im2col activation (no transpose of
    #      the inflated patches).
    # TODO(synk): replace the HBM-materialized im2col with in-kernel
    # shifted-window matmuls over NHWC tiles to remove the K^2 read
    # amplification of the activation.
    x_bf = x_nchw.astype(jnp.bfloat16)
    x_nhwc = jnp.transpose(x_bf, (0, 2, 3, 1))               # (N,H,W,Cin)
    x_g = x_nhwc.reshape(N, H, W, groups, Cin_g)
    x_g = jnp.transpose(x_g, (3, 0, 1, 2, 4))                # (g,N,H,W,Cin_g)
    xp = jnp.pad(x_g, ((0, 0), (0, 0), (pad, pad), (pad, pad), (0, 0)))
    cols = []
    for ki in range(K):
        for kj in range(K):
            cols.append(xp[:, :, ki:ki + Hout * stride:stride,
                           kj:kj + Wout * stride:stride, :])
    patches = jnp.stack(cols, axis=-1)                       # (g,N,Ho,Wo,Cin_g,K*K)
    patches = patches.reshape(groups, M, Kd_g)               # inner (cin, ki, kj)

    # ---- per-group weight matrices, rows in (cin, ki, kj) order, bf16.
    w = weight.astype(jnp.bfloat16).reshape(groups, Cout_g, Cin_g, K, K)
    w = jnp.transpose(w, (0, 2, 3, 4, 1)).reshape(groups, Kd_g, Cout_g)

    # ---- tiling (generation aware: 256-wide MXU operand shapes on v6e/v7x
    #      when the layer is big enough; 128 on v5e / tiny layers).
    Kd_p = _round_up(Kd_g, 128)
    if gen >= 6 and Kd_p > 128:
        Kd_p = _round_up(Kd_g, 256)
    KD_TILE = next(t for t in (512, 256, 128) if Kd_p % t == 0)
    num_k = Kd_p // KD_TILE

    Co_p = _round_up(Cout_g, 128)
    if gen >= 6 and Co_p > 128:
        Co_p = _round_up(Cout_g, 256)
    if Co_p <= 512:
        CO_TILE = Co_p
    else:
        CO_TILE = 256 if Co_p % 256 == 0 else 128
    num_co = Co_p // CO_TILE

    M_TILE = min(1024, _round_up(M, 8))
    M_p = _round_up(M, M_TILE)
    num_m = M_p // M_TILE

    patches_p = jnp.pad(patches, ((0, 0), (0, M_p - M), (0, Kd_p - Kd_g)))
    w_p = jnp.pad(w, ((0, 0), (0, Kd_p - Kd_g), (0, Co_p - Cout_g)))

    # v7x has 64 MiB physical VMEM per core; v5e/v6e have 128 MiB.
    vmem_limit = (48 if gen >= 7 else 64) * 1024 * 1024

    # TODO(synk): for Cout_g << 128 (grouped convs with few channels/group),
    # pack several groups into one 128-lane Co block instead of padding each
    # group to a full 128-lane tile.

    # ---- pass 1: tiled conv matmul (bf16 in / fp32 acc / bf16 out) + stats.
    y, psum, psq = pl.pallas_call(
        _conv_stats_kernel,
        out_shape=(
            jax.ShapeDtypeStruct((groups, M_p, Co_p), jnp.bfloat16),
            jax.ShapeDtypeStruct((groups, num_m, 1, Co_p), jnp.float32),
            jax.ShapeDtypeStruct((groups, num_m, 1, Co_p), jnp.float32),
        ),
        grid=(groups, num_co, num_m, num_k),
        in_specs=[
            pl.BlockSpec((None, M_TILE, KD_TILE),
                         lambda g, co, m, k: (g, m, k)),
            # Full-Kd weight block with an m/k-invariant block index: DMA'd
            # once per (group, Co-tile) and kept VMEM-resident; the k-th
            # contraction chunk is sliced inside the kernel.
            pl.BlockSpec((None, Kd_p, CO_TILE),
                         lambda g, co, m, k: (g, 0, co)),
        ],
        out_specs=(
            pl.BlockSpec((None, M_TILE, CO_TILE),
                         lambda g, co, m, k: (g, m, co)),
            pl.BlockSpec((None, None, 1, CO_TILE),
                         lambda g, co, m, k: (g, m, 0, co)),
            pl.BlockSpec((None, None, 1, CO_TILE),
                         lambda g, co, m, k: (g, m, 0, co)),
        ),
        scratch_shapes=[pltpu.VMEM((M_TILE, CO_TILE), jnp.float32)],
        compiler_params=pltpu.CompilerParams(
            dimension_semantics=("parallel", "parallel", "parallel",
                                 "arbitrary"),
            vmem_limit_bytes=vmem_limit),
    )(patches_p, w_p)

    # ---- BatchNorm2d (training mode) batch statistics in fp32.
    # Precision contract: conv runs with bf16 operands + fp32 accumulation;
    # var uses E[x^2]-E[x]^2 in fp32 with a >=0 clamp.
    total_sum = psum[:, :, 0, :Cout_g].sum(axis=1)           # (groups, Cout_g)
    total_sq = psq[:, :, 0, :Cout_g].sum(axis=1)
    mean = total_sum / float(M)
    var = jnp.maximum(total_sq / float(M) - mean * mean, 0.0)
    inv = jax.lax.rsqrt(var + eps)

    gamma_g = gamma.astype(jnp.float32).reshape(groups, Cout_g)
    beta_g = beta.astype(jnp.float32).reshape(groups, Cout_g)
    scale = gamma_g * inv                                    # (groups, Cout_g)
    shift = beta_g - mean * scale

    # ---- BN apply + ReLU + un-pad + NCHW layout as plain jnp so XLA fuses it
    #      into a single pass over y (no extra Pallas HBM round trip).
    y_g = y[:, :M, :Cout_g].astype(jnp.float32)              # (groups, M, Cout_g)
    out = y_g * scale[:, None, :] + shift[:, None, :]
    if use_act:
        out = jnp.maximum(out, 0.0)
    out = out.reshape(groups, N, Hout, Wout, Cout_g)
    out = jnp.transpose(out, (1, 0, 4, 2, 3)).reshape(N, Cout, Hout, Wout)
    return out


# ------------------------------ reference --------------------------------------

def conv_bn_act_ref(x_nchw, weight, gamma, beta, *, stride, groups,
                    use_act, eps=1e-5):
    K = weight.shape[-1]
    pad = (K - 1) // 2
    y = jax.lax.conv_general_dilated(
        x_nchw, weight, window_strides=(stride, stride),
        padding=[(pad, pad), (pad, pad)],
        dimension_numbers=('NCHW', 'OIHW', 'NCHW'),
        feature_group_count=groups)
    mean = y.mean(axis=(0, 2, 3), keepdims=True)
    var = y.var(axis=(0, 2, 3), keepdims=True)               # biased, BN train mode
    out = (y - mean) * jax.lax.rsqrt(var + eps)
    out = out * gamma.reshape(1, -1, 1, 1) + beta.reshape(1, -1, 1, 1)
    if use_act:
        out = jnp.maximum(out, 0.0)
    return out


# --------------------------------- main -----------------------------------------

def _run_case(key, N, Cin, H, W, Cout, K, stride, groups, use_act):
    kx, kw, kg, kb = jax.random.split(key, 4)
    x = jax.random.normal(kx, (N, Cin, H, W), jnp.float32)
    weight = 0.1 * jax.random.normal(kw, (Cout, Cin // groups, K, K), jnp.float32)
    gamma = 1.0 + 0.1 * jax.random.normal(kg, (Cout,), jnp.float32)
    beta = 0.1 * jax.random.normal(kb, (Cout,), jnp.float32)

    out = conv_bn_act(x, weight, gamma, beta, kernel_size=K, stride=stride,
                      groups=groups, use_act=use_act)
    out = jax.block_until_ready(out)

    ref = conv_bn_act_ref(x, weight, gamma, beta, stride=stride,
                          groups=groups, use_act=use_act)
    # bf16 MXU operands + bf16 y intermediate (fp32 accumulation / BN math)
    # -> slightly loose tolerance.
    np.testing.assert_allclose(np.asarray(out), np.asarray(ref),
                               rtol=3e-2, atol=3e-2)


if __name__ == "__main__":
    key = jax.random.PRNGKey(0)
    k1, k2 = jax.random.split(key)
    # ConvBNAct(in_channels=4, out_channels=8, kernel_size=3, stride=1)
    _run_case(k1, N=2, Cin=4, H=16, W=16, Cout=8, K=3, stride=1,
              groups=1, use_act=True)
    # grouped / strided variant: ConvBNAct(4, 8, 3, stride=2, groups=2)
    _run_case(k2, N=2, Cin=4, H=16, W=16, Cout=8, K=3, stride=2,
              groups=2, use_act=True)
    print("KERNEL_OK")
</pallas_src>

<mosaic_0001>
module attributes {stable_mosaic.version = 11 : i64} {
  func.func @_conv_stats_kernel(%arg0: i32, %arg1: i32, %arg2: i32, %arg3: i32, %arg4: memref<1x512x128xbf16, #tpu.memory_space<vmem>>, %arg5: memref<1x128x128xbf16, #tpu.memory_space<vmem>>, %arg6: memref<1x512x128xbf16, #tpu.memory_space<vmem>>, %arg7: memref<1x1x1x128xf32, #tpu.memory_space<vmem>>, %arg8: memref<1x1x1x128xf32, #tpu.memory_space<vmem>>, %arg9: memref<512x128xf32, #tpu.memory_space<vmem>>) attributes {dimension_semantics = [#tpu.dimension_semantics<parallel>, #tpu.dimension_semantics<parallel>, #tpu.dimension_semantics<parallel>, #tpu.dimension_semantics<arbitrary>], iteration_bounds = array<i64: 1, 1, 1, 1>, scalar_prefetch = 0 : i64, scratch_operands = 1 : i64, tpu.core_type = #tpu.core_type<tc>, window_params = [{transform_indices = @transform_0, window_bounds = array<i64: 1, 512, 128>}, {transform_indices = @transform_1, window_bounds = array<i64: 1, 128, 128>}, {transform_indices = @transform_2, window_bounds = array<i64: 1, 512, 128>}, {transform_indices = @transform_3, window_bounds = array<i64: 1, 1, 1, 128>}, {transform_indices = @transform_4, window_bounds = array<i64: 1, 1, 1, 128>}]} {
    %c0_i32 = arith.constant 0 : i32
    %0 = arith.cmpi eq, %arg3, %c0_i32 : i32
    %1 = arith.extui %0 : i1 to i32
    %c0_i32_0 = arith.constant 0 : i32
    %2 = arith.cmpi ne, %1, %c0_i32_0 : i32
    scf.if %2 {
      %cst_11 = arith.constant 0.000000e+00 : f32
      %17 = vector.broadcast %cst_11 : f32 to vector<512x128xf32>
      %c0_12 = arith.constant 0 : index
      %c0_13 = arith.constant 0 : index
      %18 = vector.load %arg9[%c0_12, %c0_13] : memref<512x128xf32, #tpu.memory_space<vmem>>, vector<512x128xf32>
      tpu.vector_store %arg9[%c0_12, %c0_13], %17 {strides = array<i32>} : memref<512x128xf32, #tpu.memory_space<vmem>>, vector<512x128xf32>,
    } else {
    }
    %c128_i32 = arith.constant 128 : i32
    %3 = arith.muli %arg3, %c128_i32 : i32
    %4 = tpu.assume_multiple %3, 128 : i32
    %c0 = arith.constant 0 : index
    %5 = arith.index_cast %4 : i32 to index
    %c0_1 = arith.constant 0 : index
    %6 = vector.load %arg5[%c0, %5, %c0_1] : memref<1x128x128xbf16, #tpu.memory_space<vmem>>, vector<1x128x128xbf16>
    %7 = vector.shape_cast %6 : vector<1x128x128xbf16> to vector<128x128xbf16>
    %c0_2 = arith.constant 0 : index
    %c0_3 = arith.constant 0 : index
    %8 = vector.load %arg9[%c0_2, %c0_3] : memref<512x128xf32, #tpu.memory_space<vmem>>, vector<512x128xf32>
    %c0_4 = arith.constant 0 : index
    %c0_5 = arith.constant 0 : index
    %c0_6 = arith.constant 0 : index
    %9 = vector.load %arg4[%c0_4, %c0_5, %c0_6] : memref<1x512x128xbf16, #tpu.memory_space<vmem>>, vector<1x512x128xbf16>
    %10 = vector.shape_cast %9 : vector<1x512x128xbf16> to vector<512x128xbf16>
    %cst = arith.constant dense<0.000000e+00> : vector<512x128xf32>
    %11 = tpu.matmul %10, %7, %cst {dimension_numbers = #tpu.dot_dimension_numbers<[1], [0], [0], [1], [0, 0, 1, 1], [], []>} : vector<512x128xbf16>, vector<128x128xbf16>, vector<512x128xf32> -> vector<512x128xf32>
    %12 = arith.addf %8, %11 : vector<512x128xf32>
    %c0_7 = arith.constant 0 : index
    %c0_8 = arith.constant 0 : index
    %13 = vector.load %arg9[%c0_7, %c0_8] : memref<512x128xf32, #tpu.memory_space<vmem>>, vector<512x128xf32>
    tpu.vector_store %arg9[%c0_7, %c0_8], %12 {strides = array<i32>} : memref<512x128xf32, #tpu.memory_space<vmem>>, vector<512x128xf32>,
    %c0_i32_9 = arith.constant 0 : i32
    %14 = arith.cmpi eq, %arg3, %c0_i32_9 : i32
    %15 = arith.extui %14 : i1 to i32
    %c0_i32_10 = arith.constant 0 : i32
    %16 = arith.cmpi ne, %15, %c0_i32_10 : i32
    scf.if %16 {
      %c0_11 = arith.constant 0 : index
      %c0_12 = arith.constant 0 : index
      %17 = vector.load %arg9[%c0_11, %c0_12] : memref<512x128xf32, #tpu.memory_space<vmem>>, vector<512x128xf32>
      %18 = arith.truncf %17 : vector<512x128xf32> to vector<512x128xbf16>
      %c0_13 = arith.constant 0 : index
      %c0_14 = arith.constant 0 : index
      %c0_15 = arith.constant 0 : index
      %19 = vector.load %arg6[%c0_13, %c0_14, %c0_15] : memref<1x512x128xbf16, #tpu.memory_space<vmem>>, vector<1x512x128xbf16>
      %20 = vector.shape_cast %19 : vector<1x512x128xbf16> to vector<512x128xbf16>
      %21 = vector.shape_cast %18 : vector<512x128xbf16> to vector<1x512x128xbf16>
      tpu.vector_store %arg6[%c0_13, %c0_14, %c0_15], %21 {strides = array<i32>} : memref<1x512x128xbf16, #tpu.memory_space<vmem>>, vector<1x512x128xbf16>,
      %cst_16 = arith.constant dense<0.000000e+00> : vector<128xf32>
      %22 = vector.multi_reduction <add>, %17, %cst_16 [0] : vector<512x128xf32> to vector<128xf32>
      %23 = vector.shape_cast %22 : vector<128xf32> to vector<1x128xf32>
      %c0_17 = arith.constant 0 : index
      %c0_18 = arith.constant 0 : index
      %c0_19 = arith.constant 0 : index
      %c0_20 = arith.constant 0 : index
      %24 = vector.load %arg7[%c0_17, %c0_18, %c0_19, %c0_20] : memref<1x1x1x128xf32, #tpu.memory_space<vmem>>, vector<1x1x1x128xf32>
      %25 = vector.shape_cast %24 : vector<1x1x1x128xf32> to vector<1x128xf32>
      %26 = vector.shape_cast %23 : vector<1x128xf32> to vector<1x1x1x128xf32>
      tpu.vector_store %arg7[%c0_17, %c0_18, %c0_19, %c0_20], %26 {strides = array<i32>} : memref<1x1x1x128xf32, #tpu.memory_space<vmem>>, vector<1x1x1x128xf32>,
      %27 = arith.mulf %17, %17 : vector<512x128xf32>
      %cst_21 = arith.constant dense<0.000000e+00> : vector<128xf32>
      %28 = vector.multi_reduction <add>, %27, %cst_21 [0] : vector<512x128xf32> to vector<128xf32>
      %29 = vector.shape_cast %28 : vector<128xf32> to vector<1x128xf32>
      %c0_22 = arith.constant 0 : index
      %c0_23 = arith.constant 0 : index
      %c0_24 = arith.constant 0 : index
      %c0_25 = arith.constant 0 : index
      %30 = vector.load %arg8[%c0_22, %c0_23, %c0_24, %c0_25] : memref<1x1x1x128xf32, #tpu.memory_space<vmem>>, vector<1x1x1x128xf32>
      %31 = vector.shape_cast %30 : vector<1x1x1x128xf32> to vector<1x128xf32>
      %32 = vector.shape_cast %29 : vector<1x128xf32> to vector<1x1x1x128xf32>
      tpu.vector_store %arg8[%c0_22, %c0_23, %c0_24, %c0_25], %32 {strides = array<i32>} : memref<1x1x1x128xf32, #tpu.memory_space<vmem>>, vector<1x1x1x128xf32>,
    } else {
    }
    return
  }
  func.func @transform_0(%arg0: i32, %arg1: i32, %arg2: i32, %arg3: i32) -> (i32, i32, i32) {
    %c0_i32 = arith.constant 0 : i32
    return %arg0, %arg2, %arg3 : i32, i32, i32
  }
  func.func @transform_1(%arg0: i32, %arg1: i32, %arg2: i32, %arg3: i32) -> (i32, i32, i32) {
    %c0_i32 = arith.constant 0 : i32
    %c0_i32_0 = arith.constant 0 : i32
    return %arg0, %c0_i32, %arg1 : i32, i32, i32
  }
  func.func @transform_2(%arg0: i32, %arg1: i32, %arg2: i32, %arg3: i32) -> (i32, i32, i32) {
    %c0_i32 = arith.constant 0 : i32
    return %arg0, %arg2, %arg1 : i32, i32, i32
  }
  func.func @transform_3(%arg0: i32, %arg1: i32, %arg2: i32, %arg3: i32) -> (i32, i32, i32, i32) {
    %c0_i32 = arith.constant 0 : i32
    %c0_i32_0 = arith.constant 0 : i32
    return %arg0, %arg2, %c0_i32, %arg1 : i32, i32, i32, i32
  }
  func.func @transform_4(%arg0: i32, %arg1: i32, %arg2: i32, %arg3: i32) -> (i32, i32, i32, i32) {
    %c0_i32 = arith.constant 0 : i32
    %c0_i32_0 = arith.constant 0 : i32
    return %arg0, %arg2, %c0_i32, %arg1 : i32, i32, i32, i32
  }
}

</mosaic_0001>

<bundles_post_ra>
// kernel: tpu_custom_call.1
= control target key start
LH: loop header
LB: loop body
LE: loop exit
PB: predicated region body
PF: predicated region fallthrough
CT: control target
= control target key end

     0   :  { %10 = vsyncpa [#allocation4], 0  ;;  %s2518_s0 = inlined_call_operand.hbm [shape: bf16[1,512,128], index: 0, kind: input, shape index: {}]   ;;  %s2519_s1 = inlined_call_operand.hbm [shape: bf16[1,128,128], index: 1, kind: input, shape index: {}]   ;;  %s2520_s2 = inlined_call_operand.hbm [shape: bf16[1,512,128], index: 2, kind: output, shape index: {0}]   ;;  %s2521_s3 = inlined_call_operand.hbm [shape: f32[1,1,1,128], index: 3, kind: output, shape index: {1}]   ;;  %s2522_s4 = inlined_call_operand.hbm [shape: f32[1,1,1,128], index: 4, kind: output, shape index: {2}]  }
   0x1   :  { %11 = vsyncpa [#allocation7], 0 }
   0x2   :  { %12 = vsyncpa [#allocation5], 0 }
   0x3   :  { %13 = vsyncpa [#allocation10], 0  ;;  %s2217_s15 = smov [#allocation3]   ;;  %s2099_s19 = scalar_lea.hbm %s2518_s0, 4096 }
   0x4   :  { %s19_s16 = sshll.u32 %s2217_s15, 4  ;;  %p2100_p0 = scmp.ne.s32.totalorder %s2518_s0, %s2099_s19  ;;  %s20_s16 = int_to_ptr.vmem [resolvable:$true] %s19_s16 }
   0x5   :  { %p2103_p1 = scmp.lt.u32.totalorder %s2099_s19, %s2518_s0 }
   0x7   :  { %p2105_p2 = pnand %p2103_p1, %p2100_p0 }
   0x9   :  { %2108 = shalt.err (!%p2105_p2)
}
   0xa   :  { %s2109_s24 = scalar_lea.vmem %s20_s16, 4096  ;;  %p2114_p4 = scmp.lt.s32.totalorder %s20_s16, %s20_s16 }
   0xb   :  { %p2110_p3 = scmp.ne.s32.totalorder %s20_s16, %s2109_s24  ;;  %p2115_p5 = scmp.lt.s32.totalorder %s2109_s24, %s2109_s24 }
   0xd   :  { %p2116_p6 = por %p2115_p5, %p2114_p4 }
   0xf   :  { %p2117_p7 = pnand %p2116_p6, %p2110_p3 }
  0x11   :  { %2120 = shalt.err (!%p2117_p7)
}
  0x12   :  { %s2218_s25 = smov 64   ;;  %s2219_s26 = smov 4  }
  0x13   :  { %25 = dma.hbm_to_vmem [thread:$0]  %s2518_s0, 4096, %s20_s16, [#allocation4], %s2218_s25, %s2218_s25, %s2219_s26  }
  0x14   :  { %s2220_s29 = smov [#allocation6]   ;;  %s2121_s7 = scalar_lea.hbm %s2519_s1, 1024 }
  0x15   :  { %s31_s30 = sshll.u32 %s2220_s29, 4  ;;  %p2122_p8 = scmp.ne.s32.totalorder %s2519_s1, %s2121_s7  ;;  %s32_s30 = int_to_ptr.vmem [resolvable:$true] %s31_s30 }
  0x16   :  { %p2125_p9 = scmp.lt.u32.totalorder %s2121_s7, %s2519_s1 }
  0x18   :  { %p2127_p10 = pnand %p2125_p9, %p2122_p8 }
  0x1a   :  { %2130 = shalt.err (!%p2127_p10)
}
  0x1b   :  { %s2131_s12 = scalar_lea.vmem %s32_s30, 1024  ;;  %p2136_p12 = scmp.lt.s32.totalorder %s32_s30, %s32_s30 }
  0x1c   :  { %p2132_p11 = scmp.ne.s32.totalorder %s32_s30, %s2131_s12  ;;  %p2137_p13 = scmp.lt.s32.totalorder %s2131_s12, %s2131_s12 }
  0x1e   :  { %p2138_p0 = por %p2137_p13, %p2136_p12 }
  0x20   :  { %p2139_p1 = pnand %p2138_p0, %p2132_p11 }
  0x22   :  { %2142 = shalt.err (!%p2139_p1)
}
  0x23   :  { %37 = dma.hbm_to_vmem [thread:$0]  %s2519_s1, 1024, %s32_s30, [#allocation7], %s2218_s25, %s2218_s25, %s2219_s26  }
  0x24   :  { %2209 = dma.done.wait [#allocation4], 4096  }
  0x25   :  { %2210 = vsyncadd [#allocation4], 4294963200 }
  0x26   :  { %2211 = dma.done.wait [#allocation7], 1024  }
  0x27   :  { %2212 = vsyncadd [#allocation7], 4294966272  ;;  %v2059_v0 = vld [vmem:[#allocation6] sm:$0xff]   ;;  %v2060_v1 = vld [vmem:[#allocation6 + $0x8] sm:$0xff]   ;;  %s2221_s1 = smov [#allocation8]  }
  0x28   :  { %1956 = vmatprep.subr.bf16.mxu0 %v2059_v0  ;;  %2036 = vmatprep.subr.bf16.mxu1 %v2059_v0  ;;  %v2061_v2 = vld [vmem:[#allocation6 + $0x10] sm:$0xff]   ;;  %v2062_v3 = vld [vmem:[#allocation6 + $0x18] sm:$0xff]   ;;  %v2067_v4 = vld [vmem:[#allocation3] sm:$0xff]   ;;  %s1515_s14 = sshll.u32 %s2221_s1, 4  ;;  %s1516_s14 = int_to_ptr.vmem [resolvable:$true] %s1515_s14 }
  0x29   :  { %1957 = vmatpush3.bf16.msra.mxu0 %v2059_v0  ;;  %2044 = vmatpush3.bf16.msra.mxu1 %v2059_v0  ;;  %v2063_v5 = vld [vmem:[#allocation6 + $0x20] sm:$0xff]   ;;  %v2064_v6 = vld [vmem:[#allocation6 + $0x28] sm:$0xff]   ;;  %v2065_v7 = vld [vmem:[#allocation6 + $0x30] sm:$0xff]   ;;  %s2143_s15 = scalar_lea.vmem %s1516_s14, 4096  ;;  %p2148_p3 = scmp.lt.s32.totalorder %s1516_s14, %s1516_s14 }
  0x2a   :  { %1958 = vmatprep.subr.bf16.mxu0 %v2060_v1  ;;  %2037 = vmatprep.subr.bf16.mxu1 %v2060_v1  ;;  %v2066_v8 = vld [vmem:[#allocation6 + $0x38] sm:$0xff]   ;;  %v2083_v9 = vld [vmem:[#allocation3 + $0x80] sm:$0xff]   ;;  %v2068_v10 = vld [vmem:[#allocation3 + $0x8] sm:$0xff]   ;;  %p2144_p2 = scmp.ne.s32.totalorder %s1516_s14, %s2143_s15  ;;  %p2149_p4 = scmp.lt.s32.totalorder %s2143_s15, %s2143_s15 }
  0x2b   :  { %1972 = vmatprep.mubr.bf16.mxu0 %v2067_v4  ;;  %2004 = vmatprep.mubr.bf16.mxu1 %v2083_v9  ;;  %v2069_v11 = vld [vmem:[#allocation3 + $0x10] sm:$0xff]   ;;  %v2084_v12 = vld [vmem:[#allocation3 + $0x88] sm:$0xff]   ;;  %v2070_v14 = vld [vmem:[#allocation3 + $0x18] sm:$0xff]  }
  0x2c   :  { %v2085_v13 = vld [vmem:[#allocation3 + $0x90] sm:$0xff]   ;;  %v2071_v15 = vld [vmem:[#allocation3 + $0x20] sm:$0xff]   ;;  %v2086_v16 = vld [vmem:[#allocation3 + $0x98] sm:$0xff]   ;;  %p2150_p5 = por %p2149_p4, %p2148_p3 }
  0x2d   :  { %1959 = vmatpush3.bf16.msra.mxu0 %v2060_v1  ;;  %2045 = vmatpush3.bf16.msra.mxu1 %v2060_v1  ;;  %v2087_v17 = vld [vmem:[#allocation3 + $0xa0] sm:$0xff]   ;;  %v2072_v18 = vld [vmem:[#allocation3 + $0x28] sm:$0xff]   ;;  %v2073_v20 = vld [vmem:[#allocation3 + $0x30] sm:$0xff]  }
  0x2e   :  { %1960 = vmatprep.subr.bf16.mxu0 %v2061_v2  ;;  %2038 = vmatprep.subr.bf16.mxu1 %v2061_v2  ;;  %v2088_v19 = vld [vmem:[#allocation3 + $0xa8] sm:$0xff]   ;;  %v2089_v21 = vld [vmem:[#allocation3 + $0xb0] sm:$0xff]   ;;  %v2074_v22 = vld [vmem:[#allocation3 + $0x38] sm:$0xff]   ;;  %p2151_p6 = pnand %p2150_p5, %p2144_p2 }
  0x2f   :  { %v2090_v23 = vld [vmem:[#allocation3 + $0xb8] sm:$0xff]   ;;  %v2075_v24 = vld [vmem:[#allocation3 + $0x40] sm:$0xff]   ;;  %v2076_v26 = vld [vmem:[#allocation3 + $0x48] sm:$0xff]  }
  0x30   :  { %v2091_v25 = vld [vmem:[#allocation3 + $0xc0] sm:$0xff]   ;;  %v2092_v27 = vld [vmem:[#allocation3 + $0xc8] sm:$0xff]   ;;  %v2077_v28 = vld [vmem:[#allocation3 + $0x50] sm:$0xff]  }
  0x31   :  { %1961 = vmatpush3.bf16.msra.mxu0 %v2061_v2  ;;  %2046 = vmatpush3.bf16.msra.mxu1 %v2061_v2  ;;  %v2093_v29 = vld [vmem:[#allocation3 + $0xd0] sm:$0xff]   ;;  %v2078_v30 = vld [vmem:[#allocation3 + $0x58] sm:$0xff]   ;;  %v2079_v32 = vld [vmem:[#allocation3 + $0x60] sm:$0xff]  }
  0x32   :  { %1962 = vmatprep.subr.bf16.mxu0 %v2062_v3  ;;  %2039 = vmatprep.subr.bf16.mxu1 %v2062_v3  ;;  %v2094_v31 = vld [vmem:[#allocation3 + $0xd8] sm:$0xff]   ;;  %v2095_v33 = vld [vmem:[#allocation3 + $0xe0] sm:$0xff]   ;;  %v2080_v34 = vld [vmem:[#allocation3 + $0x68] sm:$0xff]  }
  0x33   :  { %v2096_v35 = vld [vmem:[#allocation3 + $0xe8] sm:$0xff]   ;;  %v2081_v36 = vld [vmem:[#allocation3 + $0x70] sm:$0xff]   ;;  %v2082_v38 = vld [vmem:[#allocation3 + $0x78] sm:$0xff]  }
  0x34   :  { %v2097_v37 = vld [vmem:[#allocation3 + $0xf0] sm:$0xff]   ;;  %v2098_v39 = vld [vmem:[#allocation3 + $0xf8] sm:$0xff]  }
  0x35   :  { %1963 = vmatpush3.bf16.msra.mxu0 %v2062_v3  ;;  %2047 = vmatpush3.bf16.msra.mxu1 %v2062_v3 }
  0x36   :  { %1964 = vmatprep.subr.bf16.mxu0 %v2063_v5  ;;  %2040 = vmatprep.subr.bf16.mxu1 %v2063_v5 }
  0x39   :  { %1965 = vmatpush3.bf16.msra.mxu0 %v2063_v5  ;;  %2048 = vmatpush3.bf16.msra.mxu1 %v2063_v5 }
  0x3a   :  { %1966 = vmatprep.subr.bf16.mxu0 %v2064_v6  ;;  %2041 = vmatprep.subr.bf16.mxu1 %v2064_v6 }
  0x3d   :  { %1967 = vmatpush3.bf16.msra.mxu0 %v2064_v6  ;;  %2049 = vmatpush3.bf16.msra.mxu1 %v2064_v6 }
  0x3e   :  { %1968 = vmatprep.subr.bf16.mxu0 %v2065_v7  ;;  %2042 = vmatprep.subr.bf16.mxu1 %v2065_v7 }
  0x41   :  { %1969 = vmatpush3.bf16.msra.mxu0 %v2065_v7  ;;  %2050 = vmatpush3.bf16.msra.mxu1 %v2065_v7 }
  0x42   :  { %1970 = vmatprep.subr.bf16.mxu0 %v2066_v8  ;;  %2043 = vmatprep.subr.bf16.mxu1 %v2066_v8 }
  0x45   :  { %1971 = vmatpush3.bf16.msra.mxu0 %v2066_v8  ;;  %2051 = vmatpush3.bf16.msra.mxu1 %v2066_v8 }
  0x48   :  { %1973 = vmatmul.mubr.bf16.vlgmr.msra.gmra.mrb[0].mxu0 %v2068_v10  ;;  %2005 = vmatmul.mubr.bf16.vlgmr.msra.gmra.mrb[0].mxu1 %v2084_v12 }
  0x49   :  { %1976 = vmatprep.mubr.bf16.mxu0 %v2069_v11  ;;  %2008 = vmatprep.mubr.bf16.mxu1 %v2085_v13 }
  0x50   :  { %1977 = vmatmul.mubr.bf16.gmra.mrb[4].mxu0 %v2070_v14  ;;  %2009 = vmatmul.mubr.bf16.gmra.mrb[4].mxu1 %v2086_v16 }
  0x51   :  { %1980 = vmatprep.mubr.bf16.mxu0 %v2071_v15  ;;  %2012 = vmatprep.mubr.bf16.mxu1 %v2087_v17 }
  0x58   :  { %1981 = vmatmul.mubr.bf16.gmra.mrb[8].mxu0 %v2072_v18  ;;  %2013 = vmatmul.mubr.bf16.gmra.mrb[8].mxu1 %v2088_v19 }
  0x59   :  { %1984 = vmatprep.mubr.bf16.mxu0 %v2073_v20  ;;  %2016 = vmatprep.mubr.bf16.mxu1 %v2089_v21 }
  0x60   :  { %1985 = vmatmul.mubr.bf16.gmra.mrb[12].mxu0 %v2074_v22  ;;  %2017 = vmatmul.mubr.bf16.gmra.mrb[12].mxu1 %v2090_v23 }
  0x61   :  { %1988 = vmatprep.mubr.bf16.mxu0 %v2075_v24  ;;  %2020 = vmatprep.mubr.bf16.mxu1 %v2091_v25 }
  0x68   :  { %1989 = vmatmul.mubr.bf16.gmra.mrb[16].mxu0 %v2076_v26  ;;  %2021 = vmatmul.mubr.bf16.gmra.mrb[16].mxu1 %v2092_v27 }
  0x69   :  { %1992 = vmatprep.mubr.bf16.mxu0 %v2077_v28  ;;  %2024 = vmatprep.mubr.bf16.mxu1 %v2093_v29 }
  0x70   :  { %1993 = vmatmul.mubr.bf16.gmra.mrb[20].mxu0 %v2078_v30  ;;  %2025 = vmatmul.mubr.bf16.gmra.mrb[20].mxu1 %v2094_v31 }
  0x71   :  { %1996 = vmatprep.mubr.bf16.mxu0 %v2079_v32  ;;  %2028 = vmatprep.mubr.bf16.mxu1 %v2095_v33 }
  0x78   :  { %1997 = vmatmul.mubr.bf16.gmra.mrb[24].mxu0 %v2080_v34  ;;  %2029 = vmatmul.mubr.bf16.gmra.mrb[24].mxu1 %v2096_v35 }
  0x79   :  { %2000 = vmatprep.mubr.bf16.mxu0 %v2081_v36  ;;  %2032 = vmatprep.mubr.bf16.mxu1 %v2097_v37 }
  0x80   :  { %2001 = vmatmul.mubr.bf16.gmra.mrb[28].mxu0 %v2082_v38  ;;  %2033 = vmatmul.mubr.bf16.gmra.mrb[28].mxu1 %v2098_v39 }
 0x11b   :  { %v1974_v40 = vpop.f32.mrb[0].mxu0  ;;  %v2279_v41 = vpop.f32.mrb[0].mxu1 }
 0x11c   :  { %v536_v42 = vpop.f32.mrb[1].mxu0  ;;  %v2281_v43 = vpop.f32.mrb[1].mxu1  ;;  %v1378_v55 = vmul.f32 %v1974_v40, %v1974_v40 }
 0x11d   :  { %v1975_v44 = vpop.f32.mrb[2].mxu0  ;;  %v2283_v45 = vpop.f32.mrb[2].mxu1  ;;  %v1376_v46 = vmul.f32 %v536_v42, %v536_v42 }
 0x11e   :  { %v1733_v47 = vpack.c.bf16 %v1975_v44, %v1974_v40  ;;  %v539_v48 = vpop.f32.mrb[3].mxu0  ;;  %v1813_v49 = vpack.c.bf16 %v2283_v45, %v2279_v41  ;;  %v2287_v50 = vpop.f32.mrb[3].mxu1  ;;  %v1379_v58 = vmul.f32 %v1975_v44, %v1975_v44 }
 0x11f   :  { %v1728_v51 = vpack.c.bf16 %v539_v48, %v536_v42  ;;  %v1306_v52 = vadd.f32 %v539_v48, %v536_v42  ;;  %v1377_v53 = vmul.f32 %v539_v48, %v539_v48  ;;  %v1808_v54 = vpack.c.bf16 %v2287_v50, %v2281_v43 }
 0x120   :  { %1885 = vst [vmem:[#allocation8 + $0x8] sm:$0xff] %v1733_v47   ;;  %1901 = vst [vmem:[#allocation8 + $0x88] sm:$0xff] %v1813_v49  }
 0x121   :  { %1729 = vst [vmem:[#allocation8] sm:$0xff] %v1728_v51   ;;  %v1307_v56 = vadd.f32 %v1974_v40, %v1306_v52  ;;  %v1440_v57 = vadd.f32 %v1377_v53, %v1376_v46  ;;  %1900 = vst [vmem:[#allocation8 + $0x80] sm:$0xff] %v1808_v54  }
 0x123   :  { %v1441_v59 = vadd.f32 %v1440_v57, %v1378_v55  ;;  %v1978_v60 = vpop.f32.mrb[4].mxu0  ;;  %v1308_v61 = vadd.f32 %v1975_v44, %v1307_v56  ;;  %v2291_v62 = vpop.f32.mrb[4].mxu1 }
 0x124   :  { %v552_v63 = vpop.f32.mrb[5].mxu0  ;;  %v2293_v0 = vpop.f32.mrb[5].mxu1  ;;  %v1382_v15 = vmul.f32 %v1978_v60, %v1978_v60 }
 0x125   :  { %v1309_v1 = vadd.f32 %v1308_v61, %v552_v63  ;;  %v1380_v2 = vmul.f32 %v552_v63, %v552_v63  ;;  %v1442_v3 = vadd.f32 %v1441_v59, %v1379_v58  ;;  %v1979_v4 = vpop.f32.mrb[6].mxu0  ;;  %v2295_v5 = vpop.f32.mrb[6].mxu1 }
 0x126   :  { %v1743_v6 = vpack.c.bf16 %v1979_v4, %v1978_v60  ;;  %v555_v7 = vpop.f32.mrb[7].mxu0  ;;  %v1823_v8 = vpack.c.bf16 %v2295_v5, %v2291_v62  ;;  %v2299_v9 = vpop.f32.mrb[7].mxu1  ;;  %v1383_v18 = vmul.f32 %v1979_v4, %v1979_v4 }
 0x127   :  { %v1443_v10 = vadd.f32 %v1442_v3, %v1380_v2  ;;  %v1738_v11 = vpack.c.bf16 %v555_v7, %v552_v63  ;;  %v1310_v12 = vadd.f32 %v1309_v1, %v555_v7  ;;  %v1381_v13 = vmul.f32 %v555_v7, %v555_v7 }
 0x128   :  { %1887 = vst [vmem:[#allocation8 + $0x18] sm:$0xff] %v1743_v6   ;;  %1903 = vst [vmem:[#allocation8 + $0x98] sm:$0xff] %v1823_v8   ;;  %v1818_v14 = vpack.c.bf16 %v2299_v9, %v2293_v0 }
 0x129   :  { %1886 = vst [vmem:[#allocation8 + $0x10] sm:$0xff] %v1738_v11   ;;  %v1311_v16 = vadd.f32 %v1978_v60, %v1310_v12  ;;  %v1444_v17 = vadd.f32 %v1443_v10, %v1381_v13 }
 0x12a   :  { %1902 = vst [vmem:[#allocation8 + $0x90] sm:$0xff] %v1818_v14  }
 0x12b   :  { %v1445_v19 = vadd.f32 %v1444_v17, %v1382_v15  ;;  %v1982_v20 = vpop.f32.mrb[8].mxu0  ;;  %v1312_v21 = vadd.f32 %v1979_v4, %v1311_v16  ;;  %v2303_v22 = vpop.f32.mrb[8].mxu1 }
 0x12c   :  { %v568_v23 = vpop.f32.mrb[9].mxu0  ;;  %v2305_v24 = vpop.f32.mrb[9].mxu1  ;;  %v1386_v39 = vmul.f32 %v1982_v20, %v1982_v20 }
 0x12d   :  { %v1313_v25 = vadd.f32 %v1312_v21, %v568_v23  ;;  %v1384_v26 = vmul.f32 %v568_v23, %v568_v23  ;;  %v1446_v27 = vadd.f32 %v1445_v19, %v1383_v18  ;;  %v1983_v28 = vpop.f32.mrb[10].mxu0  ;;  %v2307_v29 = vpop.f32.mrb[10].mxu1 }
 0x12e   :  { %v1753_v30 = vpack.c.bf16 %v1983_v28, %v1982_v20  ;;  %v571_v31 = vpop.f32.mrb[11].mxu0  ;;  %v1833_v32 = vpack.c.bf16 %v2307_v29, %v2303_v22  ;;  %v2311_v33 = vpop.f32.mrb[11].mxu1  ;;  %v1387_v44 = vmul.f32 %v1983_v28, %v1983_v28 }
 0x12f   :  { %v1447_v34 = vadd.f32 %v1446_v27, %v1384_v26  ;;  %v1748_v35 = vpack.c.bf16 %v571_v31, %v568_v23  ;;  %v1314_v36 = vadd.f32 %v1313_v25, %v571_v31  ;;  %v1385_v37 = vmul.f32 %v571_v31, %v571_v31 }
 0x130   :  { %1889 = vst [vmem:[#allocation8 + $0x28] sm:$0xff] %v1753_v30   ;;  %1905 = vst [vmem:[#allocation8 + $0xa8] sm:$0xff] %v1833_v32   ;;  %v1828_v38 = vpack.c.bf16 %v2311_v33, %v2305_v24 }
 0x131   :  { %1888 = vst [vmem:[#allocation8 + $0x20] sm:$0xff] %v1748_v35   ;;  %v1315_v40 = vadd.f32 %v1982_v20, %v1314_v36  ;;  %v1448_v42 = vadd.f32 %v1447_v34, %v1385_v37 }
 0x132   :  { %1904 = vst [vmem:[#allocation8 + $0xa0] sm:$0xff] %v1828_v38  }
 0x133   :  { %v1449_v46 = vadd.f32 %v1448_v42, %v1386_v39  ;;  %v1986_v47 = vpop.f32.mrb[12].mxu0  ;;  %v1316_v48 = vadd.f32 %v1983_v28, %v1315_v40  ;;  %v2315_v49 = vpop.f32.mrb[12].mxu1 }
 0x134   :  { %v584_v51 = vpop.f32.mrb[13].mxu0  ;;  %v2317_v52 = vpop.f32.mrb[13].mxu1  ;;  %v1390_v6 = vmul.f32 %v1986_v47, %v1986_v47 }
 0x135   :  { %v1317_v53 = vadd.f32 %v1316_v48, %v584_v51  ;;  %v1388_v54 = vmul.f32 %v584_v51, %v584_v51  ;;  %v1450_v55 = vadd.f32 %v1449_v46, %v1387_v44  ;;  %v1987_v56 = vpop.f32.mrb[14].mxu0  ;;  %v2319_v57 = vpop.f32.mrb[14].mxu1 }
 0x136   :  { %v1763_v58 = vpack.c.bf16 %v1987_v56, %v1986_v47  ;;  %v587_v59 = vpop.f32.mrb[15].mxu0  ;;  %v1843_v60 = vpack.c.bf16 %v2319_v57, %v2315_v49  ;;  %v2323_v61 = vpop.f32.mrb[15].mxu1  ;;  %v1391_v10 = vmul.f32 %v1987_v56, %v1987_v56 }
 0x137   :  { %v1451_v63 = vadd.f32 %v1450_v55, %v1388_v54  ;;  %v1758_v1 = vpack.c.bf16 %v587_v59, %v584_v51  ;;  %v1318_v2 = vadd.f32 %v1317_v53, %v587_v59  ;;  %v1389_v3 = vmul.f32 %v587_v59, %v587_v59 }
 0x138   :  { %1891 = vst [vmem:[#allocation8 + $0x38] sm:$0xff] %v1763_v58   ;;  %1907 = vst [vmem:[#allocation8 + $0xb8] sm:$0xff] %v1843_v60   ;;  %v1838_v4 = vpack.c.bf16 %v2323_v61, %v2317_v52 }
 0x139   :  { %1890 = vst [vmem:[#allocation8 + $0x30] sm:$0xff] %v1758_v1   ;;  %v1319_v7 = vadd.f32 %v1986_v47, %v1318_v2  ;;  %v1452_v8 = vadd.f32 %v1451_v63, %v1389_v3 }
 0x13a   :  { %1906 = vst [vmem:[#allocation8 + $0xb0] sm:$0xff] %v1838_v4  }
 0x13b   :  { %v1453_v11 = vadd.f32 %v1452_v8, %v1390_v6  ;;  %v1990_v12 = vpop.f32.mrb[16].mxu0  ;;  %v1320_v13 = vadd.f32 %v1987_v56, %v1319_v7  ;;  %v2327_v14 = vpop.f32.mrb[16].mxu1 }
 0x13c   :  { %v600_v15 = vpop.f32.mrb[17].mxu0  ;;  %v2329_v16 = vpop.f32.mrb[17].mxu1  ;;  %v1394_v35 = vmul.f32 %v1990_v12, %v1990_v12 }
 0x13d   :  { %v1321_v17 = vadd.f32 %v1320_v13, %v600_v15  ;;  %v1392_v18 = vmul.f32 %v600_v15, %v600_v15  ;;  %v1454_v19 = vadd.f32 %v1453_v11, %v1391_v10  ;;  %v1991_v20 = vpop.f32.mrb[18].mxu0  ;;  %v2331_v21 = vpop.f32.mrb[18].mxu1 }
 0x13e   :  { %v1773_v23 = vpack.c.bf16 %v1991_v20, %v1990_v12  ;;  %v603_v25 = vpop.f32.mrb[19].mxu0  ;;  %v1853_v26 = vpack.c.bf16 %v2331_v21, %v2327_v14  ;;  %v2335_v27 = vpop.f32.mrb[19].mxu1  ;;  %v1395_v38 = vmul.f32 %v1991_v20, %v1991_v20 }
 0x13f   :  { %v1455_v28 = vadd.f32 %v1454_v19, %v1392_v18  ;;  %v1768_v30 = vpack.c.bf16 %v603_v25, %v600_v15  ;;  %v1322_v31 = vadd.f32 %v1321_v17, %v603_v25  ;;  %v1393_v32 = vmul.f32 %v603_v25, %v603_v25 }
 0x140   :  { %1893 = vst [vmem:[#allocation8 + $0x48] sm:$0xff] %v1773_v23   ;;  %1909 = vst [vmem:[#allocation8 + $0xc8] sm:$0xff] %v1853_v26   ;;  %v1848_v34 = vpack.c.bf16 %v2335_v27, %v2329_v16 }
 0x141   :  { %1892 = vst [vmem:[#allocation8 + $0x40] sm:$0xff] %v1768_v30   ;;  %v1323_v36 = vadd.f32 %v1990_v12, %v1322_v31  ;;  %v1456_v37 = vadd.f32 %v1455_v28, %v1393_v32 }
 0x142   :  { %1908 = vst [vmem:[#allocation8 + $0xc0] sm:$0xff] %v1848_v34  }
 0x143   :  { %v1457_v39 = vadd.f32 %v1456_v37, %v1394_v35  ;;  %v1994_v40 = vpop.f32.mrb[20].mxu0  ;;  %v1324_v42 = vadd.f32 %v1991_v20, %v1323_v36  ;;  %v2339_v44 = vpop.f32.mrb[20].mxu1 }
 0x144   :  { %v616_v46 = vpop.f32.mrb[21].mxu0  ;;  %v2341_v47 = vpop.f32.mrb[21].mxu1  ;;  %v1398_v6 = vmul.f32 %v1994_v40, %v1994_v40 }
 0x145   :  { %v1325_v48 = vadd.f32 %v1324_v42, %v616_v46  ;;  %v1396_v51 = vmul.f32 %v616_v46, %v616_v46  ;;  %v1458_v53 = vadd.f32 %v1457_v39, %v1395_v38  ;;  %v1995_v54 = vpop.f32.mrb[22].mxu0  ;;  %v2343_v55 = vpop.f32.mrb[22].mxu1 }
 0x146   :  { %v1783_v56 = vpack.c.bf16 %v1995_v54, %v1994_v40  ;;  %v619_v58 = vpop.f32.mrb[23].mxu0  ;;  %v1863_v59 = vpack.c.bf16 %v2343_v55, %v2339_v44  ;;  %v2347_v60 = vpop.f32.mrb[23].mxu1  ;;  %v1399_v10 = vmul.f32 %v1995_v54, %v1995_v54 }
 0x147   :  { %v1459_v63 = vadd.f32 %v1458_v53, %v1396_v51  ;;  %v1778_v1 = vpack.c.bf16 %v619_v58, %v616_v46  ;;  %v1326_v2 = vadd.f32 %v1325_v48, %v619_v58  ;;  %v1397_v3 = vmul.f32 %v619_v58, %v619_v58 }
 0x148   :  { %1895 = vst [vmem:[#allocation8 + $0x58] sm:$0xff] %v1783_v56   ;;  %1911 = vst [vmem:[#allocation8 + $0xd8] sm:$0xff] %v1863_v59   ;;  %v1858_v4 = vpack.c.bf16 %v2347_v60, %v2341_v47 }
 0x149   :  { %1894 = vst [vmem:[#allocation8 + $0x50] sm:$0xff] %v1778_v1   ;;  %v1327_v7 = vadd.f32 %v1994_v40, %v1326_v2  ;;  %v1460_v8 = vadd.f32 %v1459_v63, %v1397_v3 }
 0x14a   :  { %1910 = vst [vmem:[#allocation8 + $0xd0] sm:$0xff] %v1858_v4  }
 0x14b   :  { %v1461_v11 = vadd.f32 %v1460_v8, %v1398_v6  ;;  %v1998_v12 = vpop.f32.mrb[24].mxu0  ;;  %v1328_v13 = vadd.f32 %v1995_v54, %v1327_v7  ;;  %v2351_v15 = vpop.f32.mrb[24].mxu1 }
 0x14c   :  { %v632_v17 = vpop.f32.mrb[25].mxu0  ;;  %v2353_v18 = vpop.f32.mrb[25].mxu1  ;;  %v1402_v39 = vmul.f32 %v1998_v12, %v1998_v12 }
 0x14d   :  { %v1329_v19 = vadd.f32 %v1328_v13, %v632_v17  ;;  %v1400_v20 = vmul.f32 %v632_v17, %v632_v17  ;;  %v1462_v23 = vadd.f32 %v1461_v11, %v1399_v10  ;;  %v1999_v25 = vpop.f32.mrb[26].mxu0  ;;  %v2355_v26 = vpop.f32.mrb[26].mxu1 }
 0x14e   :  { %v1793_v28 = vpack.c.bf16 %v1999_v25, %v1998_v12  ;;  %v635_v30 = vpop.f32.mrb[27].mxu0  ;;  %v1873_v31 = vpack.c.bf16 %v2355_v26, %v2351_v15  ;;  %v2359_v32 = vpop.f32.mrb[27].mxu1  ;;  %v1403_v46 = vmul.f32 %v1999_v25, %v1999_v25 }
 0x14f   :  { %v1463_v34 = vadd.f32 %v1462_v23, %v1400_v20  ;;  %v1788_v35 = vpack.c.bf16 %v635_v30, %v632_v17  ;;  %v1330_v36 = vadd.f32 %v1329_v19, %v635_v30  ;;  %v1401_v37 = vmul.f32 %v635_v30, %v635_v30 }
 0x150   :  { %1897 = vst [vmem:[#allocation8 + $0x68] sm:$0xff] %v1793_v28   ;;  %1913 = vst [vmem:[#allocation8 + $0xe8] sm:$0xff] %v1873_v31   ;;  %v1868_v38 = vpack.c.bf16 %v2359_v32, %v2353_v18  ;;  %v1408_v31 = vmul.f32 %v2281_v43, %v2281_v43 }
 0x151   :  { %1896 = vst [vmem:[#allocation8 + $0x60] sm:$0xff] %v1788_v35   ;;  %v1331_v40 = vadd.f32 %v1998_v12, %v1330_v36  ;;  %v1464_v42 = vadd.f32 %v1463_v34, %v1401_v37 }
 0x152   :  { %1912 = vst [vmem:[#allocation8 + $0xe0] sm:$0xff] %v1868_v38  }
 0x153   :  { %v1465_v48 = vadd.f32 %v1464_v42, %v1402_v39  ;;  %v2002_v51 = vpop.f32.mrb[28].mxu0  ;;  %v1332_v53 = vadd.f32 %v1999_v25, %v1331_v40  ;;  %v2363_v54 = vpop.f32.mrb[28].mxu1 }
 0x154   :  { %v648_v56 = vpop.f32.mrb[29].mxu0  ;;  %v2365_v58 = vpop.f32.mrb[29].mxu1  ;;  %v1406_v19 = vmul.f32 %v2002_v51, %v2002_v51 }
 0x155   :  { %v1333_v59 = vadd.f32 %v1332_v53, %v648_v56  ;;  %v1404_v63 = vmul.f32 %v648_v56, %v648_v56  ;;  %v1466_v1 = vadd.f32 %v1465_v48, %v1403_v46  ;;  %v2003_v2 = vpop.f32.mrb[30].mxu0  ;;  %v2367_v3 = vpop.f32.mrb[30].mxu1 }
 0x156   :  { %v1803_v4 = vpack.c.bf16 %v2003_v2, %v2002_v51  ;;  %v651_v6 = vpop.f32.mrb[31].mxu0  ;;  %v1883_v7 = vpack.c.bf16 %v2367_v3, %v2363_v54  ;;  %v2371_v8 = vpop.f32.mrb[31].mxu1  ;;  %v1407_v25 = vmul.f32 %v2003_v2, %v2003_v2 }
 0x157   :  { %v1467_v10 = vadd.f32 %v1466_v1, %v1404_v63  ;;  %v1798_v11 = vpack.c.bf16 %v651_v6, %v648_v56  ;;  %v1334_v12 = vadd.f32 %v1333_v59, %v651_v6  ;;  %v1405_v13 = vmul.f32 %v651_v6, %v651_v6 }
 0x158   :  { %1899 = vst [vmem:[#allocation8 + $0x78] sm:$0xff] %v1803_v4   ;;  %1915 = vst [vmem:[#allocation8 + $0xf8] sm:$0xff] %v1883_v7   ;;  %v1878_v17 = vpack.c.bf16 %v2371_v8, %v2365_v58 }
 0x159   :  { %1898 = vst [vmem:[#allocation8 + $0x70] sm:$0xff] %v1798_v11   ;;  %v1335_v20 = vadd.f32 %v2002_v51, %v1334_v12  ;;  %v1468_v23 = vadd.f32 %v1467_v10, %v1405_v13 }
 0x15a   :  { %1914 = vst [vmem:[#allocation8 + $0xf0] sm:$0xff] %v1878_v17  }
 0x15b   :  { %v1469_v28 = vadd.f32 %v1468_v23, %v1406_v19  ;;  %v1336_v30 = vadd.f32 %v2003_v2, %v1335_v20 }
 0x15c   :  { %2154 = shalt.err (!%p2151_p6)
}
 0x15d   :  { %s2155_s18 = scalar_lea.hbm %s2520_s2, 4096 }
 0x15e   :  { %p2156_p7 = scmp.ne.s32.totalorder %s2520_s2, %s2155_s18  ;;  %p2159_p8 = scmp.lt.u32.totalorder %s2155_s18, %s2520_s2 }
 0x160   :  { %p2161_p9 = pnand %p2159_p8, %p2156_p7 }
 0x162   :  { %2164 = shalt.err (!%p2161_p9)
}
 0x163   :  { %1521 = dma.vmem_to_hbm [thread:$0]  %s1516_s14, 4096, %s2520_s2, [#allocation5], %s2218_s25, %s2218_s25, %s2219_s26   ;;  %v1337_v34 = vadd.f32 %v1336_v30, %v2281_v43  ;;  %v1470_v35 = vadd.f32 %v1469_v28, %v1407_v25  ;;  %v1409_v38 = vmul.f32 %v2287_v50, %v2287_v50  ;;  %v1410_v39 = vmul.f32 %v2279_v41, %v2279_v41 }
 0x164   :  { %v1411_v46 = vmul.f32 %v2283_v45, %v2283_v45  ;;  %v1412_v43 = vmul.f32 %v2293_v0, %v2293_v0  ;;  %v1413_v63 = vmul.f32 %v2299_v9, %v2299_v9  ;;  %v1417_v12 = vmul.f32 %v2311_v33, %v2311_v33  ;;  %s2222_s2 = smov [#allocation9]   ;;  %s2223_s26 = smov [#allocation11]  }
 0x165   :  { %v1471_v36 = vadd.f32 %v1470_v35, %v1408_v31  ;;  %v1338_v37 = vadd.f32 %v1337_v34, %v2287_v50  ;;  %v1421_v30 = vmul.f32 %v2323_v61, %v2323_v61  ;;  %s1528_s25 = sshll.u32 %s2222_s2, 4  ;;  %s1538_s27 = sshll.u32 %s2223_s26, 4  ;;  %s1529_s25 = int_to_ptr.vmem [resolvable:$true] %s1528_s25  ;;  %s2486_s27 = int_to_ptr.vmem [resolvable:$true] %s1538_s27 }
 0x166   :  { %s2165_s28 = scalar_lea.vmem %s1529_s25, 16  ;;  %s2169_s29 = scalar_lea.vmem %s1529_s25, 32 }
 0x167   :  { %v1339_v40 = vadd.f32 %v2279_v41, %v1338_v37  ;;  %v1472_v42 = vadd.f32 %v1471_v36, %v1409_v38  ;;  %v1414_v41 = vmul.f32 %v2291_v62, %v2291_v62  ;;  %p2166_p10 = scmp.ne.s32.totalorder %s1529_s25, %s2165_s28  ;;  %p2170_p11 = scmp.lt.s32.totalorder %s1529_s25, %s1529_s25 }
 0x168   :  { %p2171_p12 = scmp.lt.s32.totalorder %s2169_s29, %s2165_s28 }
 0x169   :  { %v1473_v48 = vadd.f32 %v1472_v42, %v1410_v39  ;;  %v1340_v51 = vadd.f32 %v2283_v45, %v1339_v40  ;;  %v1415_v45 = vmul.f32 %v2295_v5, %v2295_v5  ;;  %v1425_v40 = vmul.f32 %v2335_v27, %v2335_v27 }
 0x16a   :  { %p2172_p13 = por %p2171_p12, %p2170_p11 }
 0x16b   :  { %v1341_v53 = vadd.f32 %v1340_v51, %v2293_v0  ;;  %v1474_v56 = vadd.f32 %v1473_v48, %v1411_v46  ;;  %v1416_v0 = vmul.f32 %v2305_v24, %v2305_v24 }
 0x16c   :  { %p2173_p0 = pnand %p2172_p13, %p2166_p10 }
 0x16d   :  { %v1475_v59 = vadd.f32 %v1474_v56, %v1412_v43  ;;  %v1342_v50 = vadd.f32 %v1341_v53, %v2299_v9 }
 0x16f   :  { %v1343_v1 = vadd.f32 %v2291_v62, %v1342_v50  ;;  %v1476_v2 = vadd.f32 %v1475_v59, %v1413_v63  ;;  %v1418_v62 = vmul.f32 %v2303_v22, %v2303_v22  ;;  %v1429_v59 = vmul.f32 %v2347_v60, %v2347_v60 }
 0x171   :  { %v1477_v4 = vadd.f32 %v1476_v2, %v1414_v41  ;;  %v1344_v6 = vadd.f32 %v2295_v5, %v1343_v1  ;;  %v1419_v5 = vmul.f32 %v2307_v29, %v2307_v29 }
 0x173   :  { %v1345_v7 = vadd.f32 %v1344_v6, %v2305_v24  ;;  %v1478_v10 = vadd.f32 %v1477_v4, %v1415_v45  ;;  %v1420_v24 = vmul.f32 %v2317_v52, %v2317_v52  ;;  %v1433_v6 = vmul.f32 %v2359_v32, %v2359_v32 }
 0x175   :  { %v1479_v11 = vadd.f32 %v1478_v10, %v1416_v0  ;;  %v1346_v9 = vadd.f32 %v1345_v7, %v2311_v33 }
 0x177   :  { %v1347_v13 = vadd.f32 %v2303_v22, %v1346_v9  ;;  %v1480_v17 = vadd.f32 %v1479_v11, %v1417_v12  ;;  %v1422_v22 = vmul.f32 %v2315_v49, %v2315_v49 }
 0x179   :  { %v1481_v19 = vadd.f32 %v1480_v17, %v1418_v62  ;;  %v1348_v20 = vadd.f32 %v2307_v29, %v1347_v13  ;;  %v1423_v29 = vmul.f32 %v2319_v57, %v2319_v57  ;;  %v1437_v13 = vmul.f32 %v2371_v8, %v2371_v8 }
 0x17b   :  { %v1349_v23 = vadd.f32 %v1348_v20, %v2317_v52  ;;  %v1482_v25 = vadd.f32 %v1481_v19, %v1419_v5  ;;  %v1424_v52 = vmul.f32 %v2329_v16, %v2329_v16 }
 0x17d   :  { %v1483_v28 = vadd.f32 %v1482_v25, %v1420_v24  ;;  %v1350_v33 = vadd.f32 %v1349_v23, %v2323_v61 }
 0x17f   :  { %v1351_v31 = vadd.f32 %v2315_v49, %v1350_v33  ;;  %v1484_v34 = vadd.f32 %v1483_v28, %v1421_v30  ;;  %v1426_v49 = vmul.f32 %v2327_v14, %v2327_v14 }
 0x181   :  { %v1485_v35 = vadd.f32 %v1484_v34, %v1422_v22  ;;  %v1352_v36 = vadd.f32 %v2319_v57, %v1351_v31  ;;  %v1427_v57 = vmul.f32 %v2331_v21, %v2331_v21 }
 0x183   :  { %v1353_v37 = vadd.f32 %v1352_v36, %v2329_v16  ;;  %v1486_v38 = vadd.f32 %v1485_v35, %v1423_v29  ;;  %v1428_v16 = vmul.f32 %v2341_v47, %v2341_v47 }
 0x185   :  { %v1487_v39 = vadd.f32 %v1486_v38, %v1424_v52  ;;  %v1354_v61 = vadd.f32 %v1353_v37, %v2335_v27 }
 0x187   :  { %v1355_v42 = vadd.f32 %v2327_v14, %v1354_v61  ;;  %v1488_v46 = vadd.f32 %v1487_v39, %v1425_v40  ;;  %v1430_v14 = vmul.f32 %v2339_v44, %v2339_v44 }
 0x189   :  { %v1489_v48 = vadd.f32 %v1488_v46, %v1426_v49  ;;  %v1356_v51 = vadd.f32 %v2331_v21, %v1355_v42  ;;  %v1431_v21 = vmul.f32 %v2343_v55, %v2343_v55 }
 0x18b   :  { %v1357_v43 = vadd.f32 %v1356_v51, %v2341_v47  ;;  %v1490_v53 = vadd.f32 %v1489_v48, %v1427_v57  ;;  %v1432_v47 = vmul.f32 %v2353_v18, %v2353_v18 }
 0x18d   :  { %v1491_v56 = vadd.f32 %v1490_v53, %v1428_v16  ;;  %v1358_v27 = vadd.f32 %v1357_v43, %v2347_v60 }
 0x18f   :  { %v1359_v50 = vadd.f32 %v2339_v44, %v1358_v27  ;;  %v1492_v63 = vadd.f32 %v1491_v56, %v1429_v59  ;;  %v1434_v44 = vmul.f32 %v2351_v15, %v2351_v15 }
 0x191   :  { %v1493_v41 = vadd.f32 %v1492_v63, %v1430_v14  ;;  %v1360_v1 = vadd.f32 %v2343_v55, %v1359_v50  ;;  %v1435_v55 = vmul.f32 %v2355_v26, %v2355_v26 }
 0x193   :  { %v1361_v2 = vadd.f32 %v1360_v1, %v2353_v18  ;;  %v1494_v45 = vadd.f32 %v1493_v41, %v1431_v21  ;;  %v1436_v18 = vmul.f32 %v2365_v58, %v2365_v58 }
 0x195   :  { %v1495_v4 = vadd.f32 %v1494_v45, %v1432_v47  ;;  %v1362_v60 = vadd.f32 %v1361_v2, %v2359_v32 }
 0x197   :  { %v1363_v0 = vadd.f32 %v2351_v15, %v1362_v60  ;;  %v1496_v7 = vadd.f32 %v1495_v4, %v1433_v6  ;;  %v1438_v15 = vmul.f32 %v2363_v54, %v2363_v54 }
 0x199   :  { %v1497_v10 = vadd.f32 %v1496_v7, %v1434_v44  ;;  %v1364_v11 = vadd.f32 %v2355_v26, %v1363_v0  ;;  %v1439_v26 = vmul.f32 %v2367_v3, %v2367_v3 }
 0x19b   :  { %v1365_v9 = vadd.f32 %v1364_v11, %v2365_v58  ;;  %v1498_v12 = vadd.f32 %v1497_v10, %v1435_v55 }
 0x19d   :  { %v1499_v62 = vadd.f32 %v1498_v12, %v1436_v18  ;;  %v1366_v32 = vadd.f32 %v1365_v9, %v2371_v8 }
 0x19f   :  { %v1367_v17 = vadd.f32 %v2363_v54, %v1366_v32  ;;  %v1500_v5 = vadd.f32 %v1499_v62, %v1437_v13 }
 0x1a1   :  { %v1368_v19 = vadd.f32 %v2367_v3, %v1367_v17  ;;  %v1501_v20 = vadd.f32 %v1500_v5, %v1438_v15 }
 0x1a3   :  { %v1369_v58 = vrot.slane %v1368_v19, 4  ;;  %v1502_v24 = vadd.f32 %v1501_v20, %v1439_v26 }
 0x1a5   :  { %v1503_v23 = vrot.slane %v1502_v24, 4  ;;  %v1370_v25 = vadd.f32 %v1369_v58, %v1368_v19 }
 0x1a7   :  { %v1371_v28 = vrot.slane %v1370_v25, 2  ;;  %v1504_v33 = vadd.f32 %v1503_v23, %v1502_v24 }
 0x1a9   :  { %v1372_v30 = vadd.f32 %v1371_v28, %v1370_v25  ;;  %v1505_v8 = vrot.slane %v1504_v33, 2 }
 0x1ab   :  { %v1373_v22 = vrot.slane %v1372_v30, 1  ;;  %v1506_v31 = vadd.f32 %v1505_v8, %v1504_v33 }
 0x1ad   :  { %v1374_v54 = vadd.f32 %v1373_v22, %v1372_v30  ;;  %v1507_v34 = vrot.slane %v1506_v31, 1 }
 0x1af   :  { %1375 = vst [vmem:[#allocation9] sm:$0x1] %v1374_v54  ;;  %v1508_v3 = vadd.f32 %v1507_v34, %v1506_v31 }
 0x1b0   :  { %2176 = shalt.err (!%p2173_p0)
}
 0x1b1   :  { %s2177_s6 = scalar_lea.hbm %s2521_s3, 16 }
 0x1b2   :  { %p2178_p1 = scmp.ne.s32.totalorder %s2521_s3, %s2177_s6  ;;  %p2181_p2 = scmp.lt.u32.totalorder %s2177_s6, %s2521_s3 }
 0x1b4   :  { %p2183_p3 = pnand %p2181_p2, %p2178_p1 }
 0x1b6   :  { %2186 = shalt.err (!%p2183_p3)
}
 0x1b7   :  { %1531 = dma.vmem_to_hbm [thread:$0]  %s1529_s25, 16, %s2521_s3, [#allocation10]   ;;  %1509 = vst [vmem:[#allocation11] sm:$0x1] %v1508_v3 }
 0x1b8   :  { %s2187_s0 = scalar_lea.vmem %s2486_s27, 16  ;;  %s2191_s13 = scalar_lea.vmem %s2486_s27, 32 }
 0x1b9   :  { %p2188_p4 = scmp.ne.s32.totalorder %s2486_s27, %s2187_s0  ;;  %p2192_p5 = scmp.lt.s32.totalorder %s2486_s27, %s2486_s27 }
 0x1ba   :  { %p2193_p6 = scmp.lt.s32.totalorder %s2191_s13, %s2187_s0 }
 0x1bc   :  { %p2194_p7 = por %p2193_p6, %p2192_p5 }
 0x1be   :  { %p2195_p8 = pnand %p2194_p7, %p2188_p4 }
 0x1c0   :  { %2198 = shalt.err (!%p2195_p8)
}
 0x1c1   :  { %s2199_s15 = scalar_lea.hbm %s2522_s4, 16 }
 0x1c2   :  { %p2200_p9 = scmp.ne.s32.totalorder %s2522_s4, %s2199_s15  ;;  %p2203_p10 = scmp.lt.u32.totalorder %s2199_s15, %s2522_s4 }
 0x1c4   :  { %p2205_p11 = pnand %p2203_p10, %p2200_p9 }
 0x1c6   :  { %2208 = shalt.err (!%p2205_p11)
}
 0x1c7   :  { %1541 = dma.vmem_to_hbm [thread:$0]  %s2486_s27, 16, %s2522_s4, [#allocation10]  }
 0x1c8   :  { %2213 = dma.done.wait [#allocation5], 4096  }
 0x1c9   :  { %2214 = vsyncadd [#allocation5], 4294963200 }
 0x1ca   :  { %2215 = dma.done.wait [#allocation10], 32  }
 0x1cb   :  { %2216 = vsyncadd [#allocation10], 4294967264 }
 0x1cc   :  { %1551 = vsyncpa [#allocation4], 1 }
 0x1cd   :  { %1552 = vsyncpa [#allocation7], 1 }
 0x1ce   :  { %1553 = vsyncpa [#allocation5], 1 }
 0x1cf   :  { %1554 = vsyncpa [#allocation10], 1 }

</bundles_post_ra>
